<compile_context>
chip_gen: v5e
topology: v5e:2x2
jax: 0.10.0
libtpu: 0.0.40
codegen_flags: <defaults>
</compile_context>

<pallas_src>
import functools

import jax
import jax.numpy as jnp
from jax.experimental import pallas as pl
from jax.experimental.pallas import tpu as pltpu

_PAIRWISE_EPS = 1e-6  # matches torch.nn.functional.pairwise_distance default eps


def _contrastive_loss_kernel(x1_ref, x2_ref, label_ref, out_ref, *,
                             margin, batch, tile_rows):
    # x1_ref, x2_ref: (TB, D) storage-dtype blocks in VMEM
    # label_ref:      (TB, 1) float32 block in VMEM
    # out_ref:        (8, 128) float32 block — this tile's partial sum goes in [0, 0]
    i = pl.program_id(0)

    # Load in storage dtype, do the math in f32 on-chip (keep it off the MXU).
    x1 = x1_ref[...].astype(jnp.float32)
    x2 = x2_ref[...].astype(jnp.float32)
    diff = x1 - x2 + _PAIRWISE_EPS                                  # (TB, D)

    # d^2 directly for the positive branch; sqrt (EUP) only for the hinge branch.
    sumsq = jnp.sum(diff * diff, axis=-1, keepdims=True)            # (TB, 1) == d^2
    dist = jnp.sqrt(sumsq)                                          # (TB, 1)

    label = label_ref[...]                                          # (TB, 1)
    hinge = jnp.maximum(margin - dist, 0.0)
    per_row = (1.0 - label) * sumsq + label * (hinge * hinge)       # (TB, 1)

    # Mask rows past the true batch size (partial last tile) before reducing.
    row = i * tile_rows + jax.lax.broadcasted_iota(jnp.int32, per_row.shape, 0)
    per_row = jnp.where(row < batch, per_row, 0.0)

    partial = jnp.sum(per_row)                                      # scalar f32

    # Write the scalar partial into element [0, 0] of this tile's (8,128) output block,
    # zeros elsewhere; the wrapper sums the whole output so only the partials contribute.
    r = jax.lax.broadcasted_iota(jnp.int32, (8, 128), 0)
    c = jax.lax.broadcasted_iota(jnp.int32, (8, 128), 1)
    out_ref[...] = jnp.where((r == 0) & (c == 0), partial, 0.0)


def contrastive_loss(output1, output2, label, margin=2.0, target_block_bytes=2 << 20):
    """Pallas TPU contrastive loss.

    output1/output2: (B, D) feature vectors (kept in their storage dtype, e.g. bf16/f32);
    label: (B,). Returns a scalar float32 loss.
    `target_block_bytes` controls the per-input feature block size (~1-4 MiB recommended).
    """
    B, D = output1.shape
    label2d = label.reshape(B, 1).astype(jnp.float32)
    itemsize = jnp.dtype(output1.dtype).itemsize

    # ---- generation-aware VMEM budget -------------------------------------------------
    try:
        vmem_cap = int(pltpu.get_tpu_info().vmem_capacity_bytes)
    except Exception:
        vmem_cap = 64 << 20            # conservative fallback (v7x-sized)
    vmem_budget = vmem_cap // 2        # leave the rest for compiler scratch / headroom
    headroom = 2 << 20

    # ---- byte-targeted tile size -------------------------------------------------------
    # sublane granularity for the feature dtype (f32: 8, bf16: 16, int8/fp8: 32)
    sublane = max(8, 32 // itemsize)
    row_bytes = D * itemsize
    # Double-buffered VMEM per row of tile:
    #   2 feature inputs x 2 buffers x row_bytes
    # + 2 buffers x lane-padded (128-lane) f32 label row
    per_row_vmem = 2 * 2 * row_bytes + 2 * 128 * 4

    tb_from_target = max(target_block_bytes // max(row_bytes, 1), 1)
    tb_from_vmem = max((vmem_budget - headroom) // per_row_vmem, sublane)
    tb = min(tb_from_target, tb_from_vmem)
    tb = max((tb // sublane) * sublane, sublane)
    if tb >= B:
        tb = B                          # single full-extent block is always layout-legal
    num_tiles = (B + tb - 1) // tb

    # ---- explicit scoped-VMEM declaration (no hard clamp; tb already fits the budget) --
    feat_block = tb * row_bytes
    label_block = tb * 128 * 4          # lane-padded label block in VMEM
    out_block = 8 * 128 * 4
    vmem_need = 2 * 2 * feat_block + 2 * label_block + 2 * out_block + headroom
    vmem_limit = int(min(max(vmem_need, 16 << 20), int(vmem_cap * 0.9)))

    kernel = functools.partial(
        _contrastive_loss_kernel,
        margin=float(margin),
        batch=int(B),
        tile_rows=int(tb),
    )

    partials = pl.pallas_call(
        kernel,
        out_shape=jax.ShapeDtypeStruct((num_tiles * 8, 128), jnp.float32),
        grid_spec=pltpu.PrefetchScalarGridSpec(
            num_scalar_prefetch=0,
            grid=(num_tiles,),
            in_specs=[
                pl.BlockSpec((tb, D), lambda i: (i, 0)),
                pl.BlockSpec((tb, D), lambda i: (i, 0)),
                pl.BlockSpec((tb, 1), lambda i: (i, 0)),
            ],
            out_specs=pl.BlockSpec((8, 128), lambda i: (i, 0)),
        ),
        compiler_params=pltpu.CompilerParams(
            dimension_semantics=("parallel",),   # independent per-tile partials -> megacore OK
            vmem_limit_bytes=vmem_limit,
        ),
    )(output1, output2, label2d)

    # Tree-reduce the per-tile partial sums (only element [0,0] of each 8x128 block is nonzero).
    return jnp.sum(partials) * (1.0 / B)


def _reference_loss(output1, output2, label, margin=2.0):
    # Pure-JAX reference mirroring the PyTorch semantics (math in f32).
    x1 = output1.astype(jnp.float32)
    x2 = output2.astype(jnp.float32)
    d = jnp.linalg.norm(x1 - x2 + _PAIRWISE_EPS, axis=-1)
    lbl = label.astype(jnp.float32)
    return jnp.mean((1.0 - lbl) * d**2 + lbl * jnp.clip(margin - d, 0.0) ** 2)


if __name__ == "__main__":
    key = jax.random.PRNGKey(0)
    k1, k2, k3, k4, k5, k6 = jax.random.split(key, 6)

    # Case 1: small Siamese embedding batch, single tile (f32).
    B, D = 8, 32
    o1 = jax.random.normal(k1, (B, D), dtype=jnp.float32)
    o2 = jax.random.normal(k2, (B, D), dtype=jnp.float32)
    lbl = jax.random.bernoulli(k3, 0.5, (B,)).astype(jnp.float32)

    loss = jax.block_until_ready(contrastive_loss(o1, o2, lbl, margin=2.0))
    ref = _reference_loss(o1, o2, lbl, margin=2.0)
    assert jnp.allclose(loss, ref, rtol=1e-5, atol=1e-5), (loss, ref)

    # Case 2: multi-tile grid with a partial last tile (small byte target forces tiling,
    # exercising the per-tile partial sums + row masking).
    B2, D2 = 40, 32
    o1b = jax.random.normal(k4, (B2, D2), dtype=jnp.float32)
    o2b = jax.random.normal(k5, (B2, D2), dtype=jnp.float32)
    lblb = jax.random.bernoulli(k6, 0.5, (B2,)).astype(jnp.float32)

    loss2 = jax.block_until_ready(
        contrastive_loss(o1b, o2b, lblb, margin=2.0, target_block_bytes=2048))
    ref2 = _reference_loss(o1b, o2b, lblb, margin=2.0)
    assert jnp.allclose(loss2, ref2, rtol=1e-5, atol=1e-5), (loss2, ref2)

    # Case 3: bf16 storage dtype streamed as-is, upcast inside the kernel.
    o1c = o1b.astype(jnp.bfloat16)
    o2c = o2b.astype(jnp.bfloat16)
    loss3 = jax.block_until_ready(
        contrastive_loss(o1c, o2c, lblb, margin=2.0, target_block_bytes=2048))
    ref3 = _reference_loss(o1c, o2c, lblb, margin=2.0)
    assert jnp.allclose(loss3, ref3, rtol=1e-4, atol=1e-5), (loss3, ref3)

    print("KERNEL_OK")
</pallas_src>

<mosaic_0001>
module attributes {stable_mosaic.version = 11 : i64} {
  func.func @_contrastive_loss_kernel(%arg0: i32, %arg1: memref<8x32xf32, #tpu.memory_space<vmem>>, %arg2: memref<8x32xf32, #tpu.memory_space<vmem>>, %arg3: memref<8x1xf32, #tpu.memory_space<vmem>>, %arg4: memref<8x128xf32, #tpu.memory_space<vmem>>) attributes {dimension_semantics = [#tpu.dimension_semantics<parallel>], iteration_bounds = array<i64: 1>, scalar_prefetch = 0 : i64, scratch_operands = 0 : i64, tpu.core_type = #tpu.core_type<tc>, window_params = [{transform_indices = @transform_0, window_bounds = array<i64: 8, 32>}, {transform_indices = @transform_1, window_bounds = array<i64: 8, 32>}, {transform_indices = @transform_2, window_bounds = array<i64: 8, 1>}, {transform_indices = @transform_3, window_bounds = array<i64: 8, 128>}]} {
    %c0 = arith.constant 0 : index
    %c0_0 = arith.constant 0 : index
    %0 = vector.load %arg1[%c0, %c0_0] : memref<8x32xf32, #tpu.memory_space<vmem>>, vector<8x32xf32>
    %c0_1 = arith.constant 0 : index
    %c0_2 = arith.constant 0 : index
    %1 = vector.load %arg2[%c0_1, %c0_2] : memref<8x32xf32, #tpu.memory_space<vmem>>, vector<8x32xf32>
    %2 = arith.subf %0, %1 : vector<8x32xf32>
    %cst = arith.constant 9.99999997E-7 : f32
    %3 = vector.broadcast %cst : f32 to vector<8x32xf32>
    %4 = arith.addf %2, %3 : vector<8x32xf32>
    %5 = arith.mulf %4, %4 : vector<8x32xf32>
    %cst_3 = arith.constant dense<0.000000e+00> : vector<8xf32>
    %6 = vector.multi_reduction <add>, %5, %cst_3 [1] : vector<8x32xf32> to vector<8xf32>
    %7 = vector.shape_cast %6 : vector<8xf32> to vector<8x1xf32>
    %8 = math.sqrt %7 : vector<8x1xf32>
    %c0_4 = arith.constant 0 : index
    %c0_5 = arith.constant 0 : index
    %9 = vector.load %arg3[%c0_4, %c0_5] : memref<8x1xf32, #tpu.memory_space<vmem>>, vector<8x1xf32>
    %cst_6 = arith.constant 2.000000e+00 : f32
    %10 = vector.broadcast %cst_6 : f32 to vector<8x1xf32>
    %11 = arith.subf %10, %8 : vector<8x1xf32>
    %cst_7 = arith.constant 0.000000e+00 : f32
    %12 = vector.broadcast %cst_7 : f32 to vector<8x1xf32>
    %13 = arith.maximumf %11, %12 : vector<8x1xf32>
    %cst_8 = arith.constant 1.000000e+00 : f32
    %14 = vector.broadcast %cst_8 : f32 to vector<8x1xf32>
    %15 = arith.subf %14, %9 : vector<8x1xf32>
    %16 = arith.mulf %15, %7 : vector<8x1xf32>
    %17 = arith.mulf %13, %13 : vector<8x1xf32>
    %18 = arith.mulf %9, %17 : vector<8x1xf32>
    %19 = arith.addf %16, %18 : vector<8x1xf32>
    %c8_i32 = arith.constant 8 : i32
    %20 = arith.muli %arg0, %c8_i32 : i32
    %21 = tpu.iota {dimensions = array<i32: 0>} : vector<8x1xi32>
    %22 = vector.broadcast %20 : i32 to vector<8x1xi32>
    %23 = arith.addi %22, %21 : vector<8x1xi32>
    %c8_i32_9 = arith.constant 8 : i32
    %24 = vector.broadcast %c8_i32_9 : i32 to vector<8x1xi32>
    %25 = arith.cmpi slt, %23, %24 : vector<8x1xi32>
    %cst_10 = arith.constant 0.000000e+00 : f32
    %26 = vector.broadcast %cst_10 : f32 to vector<8x1xf32>
    %27 = arith.select %25, %19, %26 : vector<8x1xi1>, vector<8x1xf32>
    %28 = vector.shape_cast %27 : vector<8x1xf32> to vector<1x8x1xf32>
    %cst_11 = arith.constant dense<0.000000e+00> : vector<1xf32>
    %29 = vector.multi_reduction <add>, %28, %cst_11 [1, 2] : vector<1x8x1xf32> to vector<1xf32>
    %30 = vector.shape_cast %29 : vector<1xf32> to vector<1x1x1xf32>
    %31 = vector.extract %30[0, 0, 0] : f32 from vector<1x1x1xf32>
    %32 = tpu.iota {dimensions = array<i32: 0>} : vector<8x128xi32>
    %33 = tpu.iota {dimensions = array<i32: 1>} : vector<8x128xi32>
    %c0_i32 = arith.constant 0 : i32
    %34 = vector.broadcast %c0_i32 : i32 to vector<8x128xi32>
    %35 = arith.cmpi eq, %32, %34 : vector<8x128xi32>
    %c0_i32_12 = arith.constant 0 : i32
    %36 = vector.broadcast %c0_i32_12 : i32 to vector<8x128xi32>
    %37 = arith.cmpi eq, %33, %36 : vector<8x128xi32>
    %38 = arith.andi %35, %37 : vector<8x128xi1>
    %cst_13 = arith.constant 0.000000e+00 : f32
    %39 = vector.broadcast %31 : f32 to vector<8x128xf32>
    %40 = vector.broadcast %cst_13 : f32 to vector<8x128xf32>
    %41 = arith.select %38, %39, %40 : vector<8x128xi1>, vector<8x128xf32>
    %c0_14 = arith.constant 0 : index
    %c0_15 = arith.constant 0 : index
    %42 = vector.load %arg4[%c0_14, %c0_15] : memref<8x128xf32, #tpu.memory_space<vmem>>, vector<8x128xf32>
    tpu.vector_store %arg4[%c0_14, %c0_15], %41 {strides = array<i32>} : memref<8x128xf32, #tpu.memory_space<vmem>>, vector<8x128xf32>,
    return
  }
  func.func @transform_0(%arg0: i32) -> (i32, i32) {
    %c0_i32 = arith.constant 0 : i32
    %c0_i32_0 = arith.constant 0 : i32
    return %arg0, %c0_i32 : i32, i32
  }
  func.func @transform_1(%arg0: i32) -> (i32, i32) {
    %c0_i32 = arith.constant 0 : i32
    %c0_i32_0 = arith.constant 0 : i32
    return %arg0, %c0_i32 : i32, i32
  }
  func.func @transform_2(%arg0: i32) -> (i32, i32) {
    %c0_i32 = arith.constant 0 : i32
    %c0_i32_0 = arith.constant 0 : i32
    return %arg0, %c0_i32 : i32, i32
  }
  func.func @transform_3(%arg0: i32) -> (i32, i32) {
    %c0_i32 = arith.constant 0 : i32
    %c0_i32_0 = arith.constant 0 : i32
    return %arg0, %c0_i32 : i32, i32
  }
}

</mosaic_0001>

<bundles_post_ra>
// kernel: tpu_custom_call.1
= control target key start
LH: loop header
LB: loop body
LE: loop exit
PB: predicated region body
PF: predicated region fallthrough
CT: control target
= control target key end

     0   :  { %8 = vsyncpa [#allocation3], 0  ;;  %s193_s0 = inlined_call_operand.vmem [shape: f32[8,32], index: 0, kind: input, shape index: {}]   ;;  %s194_s1 = inlined_call_operand.hbm [shape: f32[8,32], index: 1, kind: input, shape index: {}]   ;;  %s195_s2 = inlined_call_operand.vmem [shape: f32[8,1], index: 2, kind: input, shape index: {}]   ;;  %s196_s3 = inlined_call_operand.hbm [shape: f32[8,128], index: 3, kind: output, shape index: {}]  }
   0x1   :  { %9 = vsyncpa [#allocation4], 0  ;;  %s17_s14 = sshll.u32 %s194_s1, 4  ;;  %s159_s15 = smov [#allocation2]   ;;  %s18_s14 = int_to_ptr.hbm [resolvable:$true] %s17_s14 }
   0x2   :  { %s19_s16 = sshll.u32 %s159_s15, 4  ;;  %s20_s16 = int_to_ptr.vmem [resolvable:$true] %s19_s16 }
   0x3   :  { %22 = dma.hbm_to_vmem [thread:$0]  %s18_s14, 128, %s20_s16, [#allocation3]  }
   0x4   :  { %155 = dma.done.wait [#allocation3], 128  }
   0x5   :  { %156 = vsyncadd [#allocation3], 4294967168  ;;  %v29_v0 = vld [vmem:[%s193_s0] sm:$0xff]  ;;  %vm34_vm0 = vcmask 261120   ;;  %vm65_vm3 = vcmask 7168   ;;  %v59_v33 = vlaneseq  ;;  %s91_s22 = sshll.u32 %s196_s3, 4  ;;  %s92_s22 = int_to_ptr.hbm [resolvable:$true] %s91_s22 }
   0x6   :  { %v30_v1 = vld [vmem:[#allocation2] sm:$0xff] }
   0x7   :  { %v31_v2 = vsub.f32 %v29_v0, %v30_v1  ;;  %v50_v17 = vld [vmem:[%s195_s2] sm:$0xff]  ;;  %v60_v34 = vshrl.u32 %v59_v33, 7  ;;  %v77_v35 = vand.u32 127, %v59_v33  ;;  %s160_s2 = smov [#allocation5]  }
   0x8   :  { %v53_v20 = vsub.f32 1.0, %v50_v17  ;;  %s89_s19 = sshll.u32 %s160_s2, 4  ;;  %s90_s19 = int_to_ptr.vmem [resolvable:$true] %s89_s19 }
   0x9   :  { %v32_v3 = vadd.f32 1e-06, %v31_v2  ;;  %vm78_vm4 = vcmp.eq.s32.totalorder %v60_v34, 0  ;;  %vm79_vm5 = vcmp.eq.s32.totalorder %v77_v35, 0 }
   0xa   :  { %vm80_vm6 = vmand %vm78_vm4, %vm79_vm5 }
   0xb   :  { %v33_v4 = vmul.f32 %v32_v3, %v32_v3 }
   0xd   :  { %v35_v5 = vsel %vm34_vm0, %v33_v4, 0.0 }
   0xe   :  { %36 = vadd.xlane.f32.xlu0 %v35_v5 }
  0x81   :  { %v37_v6 = vpop.xlane.xlu0 %36 }
  0x82   :  { %105 = vrsqrt.f32 %v37_v6  ;;  %vm45_vm1 = vcmp.eq.f32.partialorder %v37_v6, inf  ;;  %v48_v14 = vand.u32 2147483648, %v37_v6  ;;  %vm47_vm2 = vcmp.eq.f32.partialorder %v37_v6, 0.0 }
  0x83   :  { %v54_v22 = vmul.f32 %v53_v20, %v37_v6 }
  0x88   :  { %v106_v7 = vpop.eup %105 }
  0x89   :  { %v39_v8 = vmul.f32 %v106_v7, %v37_v6 }
  0x8b   :  { %v40_v9 = vmul.f32 %v106_v7, %v39_v8 }
  0x8d   :  { %v41_v10 = vmul.f32 0.5, %v40_v9 }
  0x8f   :  { %v42_v11 = vsub.f32 1.5, %v41_v10 }
  0x91   :  { %v43_v12 = vmul.f32 %v106_v7, %v42_v11 }
  0x93   :  { %v44_v13 = vmul.f32 %v43_v12, %v37_v6 }
  0x95   :  { %v46_v15 = vsel %vm45_vm1, %v37_v6, %v44_v13 }
  0x96   :  { %v49_v16 = vsel %vm47_vm2, %v48_v14, %v46_v15 }
  0x97   :  { %v51_v18 = vsub.f32 2.0, %v49_v16 }
  0x99   :  { %v52_v19 = vmax.f32 %v51_v18, 0.0 }
  0x9b   :  { %v55_v21 = vmul.f32 %v52_v19, %v52_v19 }
  0x9d   :  { %v56_v23 = vmul.f32 %v55_v21, %v50_v17 }
  0x9f   :  { %v57_v24 = vadd.f32 %v56_v23, %v54_v22 }
  0xa1   :  { %v66_v25 = vsel %vm65_vm3, %v57_v24, 0.0 }
  0xa2   :  { %67 = vadd.xlane.f32.xlu0 %v66_v25 }
 0x115   :  { %v68_v26 = vpop.xlane.xlu0 %67 }
 0x116   :  { %v69_v27 = vrot.slane %v68_v26, 4 }
 0x118   :  { %v70_v28 = vadd.f32 %v69_v27, %v68_v26 }
 0x11a   :  { %v71_v29 = vrot.slane %v70_v28, 2 }
 0x11c   :  { %v72_v30 = vadd.f32 %v71_v29, %v70_v28 }
 0x11e   :  { %v73_v31 = vrot.slane %v72_v30, 1 }
 0x120   :  { %v74_v32 = vadd.f32 %v73_v31, %v72_v30 }
 0x122   :  { %101 = vpush %v74_v32 }
 0x153   :  { %s102_s23 = spop %101 }
 0x154   :  { %v81_v36 = vstv %s102_s23 }
 0x155   :  { %v82_v37 = vsel %vm80_vm6, %v81_v36, 0.0 }
 0x156   :  { %83 = vst [vmem:[#allocation5] sm:$0xff] %v82_v37 }
 0x157   :  { %94 = dma.vmem_to_hbm [thread:$0]  %s90_s19, 128, %s92_s22, [#allocation4]  }
 0x158   :  { %157 = dma.done.wait [#allocation4], 128  }
 0x159   :  { %158 = vsyncadd [#allocation4], 4294967168 }
 0x15a   :  { %99 = vsyncpa [#allocation3], 1 }
 0x15b   :  { %100 = vsyncpa [#allocation4], 1 }

</bundles_post_ra>
